<compile_context>
chip_gen: v5e
topology: v5e:2x2
jax: 0.10.0
libtpu: 0.0.40
codegen_flags: <defaults>
</compile_context>

<pallas_src>
import math

import jax
import jax.numpy as jnp
from jax.experimental import pallas as pl
from jax.experimental.pallas import tpu as pltpu


def _round_up(x, n):
    return ((x + n - 1) // n) * n


def _sublane_multiple(dtype):
    size = jnp.dtype(dtype).itemsize
    if size >= 4:
        return 8
    if size == 2:
        return 16
    return 32


def _linear_kernel(x_ref, w_ref, b_ref, o_ref):
    # x_ref: (tm, K) row tile; w_ref: (K, N_pad) resident weight (already
    # transposed in the wrapper); b_ref: (1, N_pad) f32; o_ref: (tm, N_pad).
    acc = jnp.dot(x_ref[...], w_ref[...], preferred_element_type=jnp.float32)
    o_ref[...] = (acc + b_ref[...]).astype(o_ref.dtype)


def action_embedder_forward(x, weight, bias, *, tm_max=8192,
                            vmem_tile_budget_bytes=8 << 20):
    """x: [..., action_size]; weight: [hidden, action] (PyTorch layout); bias: [hidden]."""
    *lead, action_size = x.shape
    hidden_size = weight.shape[0]
    m = int(math.prod(lead)) if lead else 1

    x2d = x.reshape(m, action_size)

    # ---- One-time parameter prep (outside the kernel, outside the grid) ----
    n_pad = _round_up(hidden_size, 128)          # lane-dense output width
    w_t = weight.T                               # (K, N): contract K on dim 0
    b_f32 = bias.astype(jnp.float32)
    if n_pad != hidden_size:
        w_t = jnp.pad(w_t, ((0, 0), (0, n_pad - hidden_size)))
        b_f32 = jnp.pad(b_f32, (0, n_pad - hidden_size))
    b2d = b_f32.reshape(1, n_pad)

    # ---- Row-tile size from a VMEM byte budget -----------------------------
    sub = _sublane_multiple(x.dtype)
    bpe_x = jnp.dtype(x.dtype).itemsize
    bpe_o = bpe_x  # output dtype == input dtype
    bpe_w = jnp.dtype(w_t.dtype).itemsize
    k_lane = _round_up(action_size, 128)         # VMEM lane footprint of an x row
    row_bytes = 2 * (k_lane * bpe_x + n_pad * bpe_o)   # double-buffered x + out
    tm_budget = max(sub, (vmem_tile_budget_bytes // row_bytes) // sub * sub)
    tm = min(tm_budget, max(sub, tm_max), _round_up(m, sub))
    # v7x: keep >= 2 grid steps whenever m spans more than one sublane tile so
    # the "parallel" M axis actually splits across both TensorCores.
    if m > sub:
        tm = min(tm, _round_up(pl.cdiv(m, 2), sub))
    tm = max(tm, sub)

    grid = (pl.cdiv(m, tm),)

    # ---- VMEM limit derived from the actual buffers (clamped to v7x 64 MiB) --
    w_sub = _sublane_multiple(w_t.dtype)
    vmem_need = (
        2 * tm * k_lane * bpe_x                          # double-buffered x tiles
        + 2 * tm * n_pad * bpe_o                         # double-buffered out tiles
        + _round_up(action_size, w_sub) * n_pad * bpe_w  # resident W
        + 8 * n_pad * 4                                  # resident bias row (f32)
    )
    vmem_limit = min(64 * 1024 * 1024, int(vmem_need * 1.5) + (2 << 20))

    cost = pl.CostEstimate(
        flops=2 * m * action_size * n_pad,
        transcendentals=0,
        bytes_accessed=(
            bpe_x * m * action_size
            + bpe_o * m * n_pad
            + w_t.size * bpe_w
            + b2d.size * 4
        ),
    )

    out2d = pl.pallas_call(
        _linear_kernel,
        out_shape=jax.ShapeDtypeStruct((m, n_pad), x.dtype),
        grid_spec=pltpu.PrefetchScalarGridSpec(
            num_scalar_prefetch=0,
            grid=grid,
            in_specs=[
                pl.BlockSpec((tm, action_size), lambda i: (i, 0)),
                # Full-array blocks with constant index_map -> resident in VMEM.
                pl.BlockSpec((action_size, n_pad), lambda i: (0, 0)),
                pl.BlockSpec((1, n_pad), lambda i: (0, 0)),
            ],
            out_specs=pl.BlockSpec((tm, n_pad), lambda i: (i, 0)),
        ),
        compiler_params=pltpu.CompilerParams(
            dimension_semantics=("parallel",),
            vmem_limit_bytes=vmem_limit,
        ),
        cost_estimate=cost,
    )(x2d, w_t, b2d)

    if n_pad != hidden_size:
        out2d = out2d[:, :hidden_size]
    return out2d.reshape(*lead, hidden_size)


if __name__ == "__main__":
    batch, seq = 2, 8
    action_size, hidden_size = 32, 64

    key = jax.random.PRNGKey(0)
    k_x, k_w, k_b = jax.random.split(key, 3)

    # Deterministic params mimicking nn.Linear's uniform(-1/sqrt(in), 1/sqrt(in))
    bound = 1.0 / math.sqrt(action_size)
    weight = jax.random.uniform(
        k_w, (hidden_size, action_size), jnp.float32, -bound, bound
    )
    bias = jax.random.uniform(k_b, (hidden_size,), jnp.float32, -bound, bound)

    x = jax.random.normal(k_x, (batch, seq, action_size), jnp.float32)

    # Small-m path (hidden < 128 -> lane-padded output, sliced back).
    out = action_embedder_forward(x, weight, bias)
    out = jax.block_until_ready(out)
    ref = x @ weight.T + bias
    assert out.shape == (batch, seq, hidden_size)
    assert jnp.allclose(out, ref, atol=1e-5, rtol=1e-5)

    # Multi-tile + ragged last block (m % tm != 0, handled by pl.cdiv grid).
    x2 = jax.random.normal(jax.random.PRNGKey(1), (3, 7, action_size), jnp.float32)
    out2 = action_embedder_forward(x2, weight, bias, tm_max=8)
    out2 = jax.block_until_ready(out2)
    ref2 = x2 @ weight.T + bias
    assert out2.shape == (3, 7, hidden_size)
    assert jnp.allclose(out2, ref2, atol=1e-5, rtol=1e-5)

    # Lane-aligned path (hidden multiple of 128 -> no column padding/slice).
    a3, h3 = 128, 128
    w3 = jax.random.uniform(jax.random.PRNGKey(2), (h3, a3), jnp.float32,
                            -1.0 / math.sqrt(a3), 1.0 / math.sqrt(a3))
    b3 = jax.random.uniform(jax.random.PRNGKey(3), (h3,), jnp.float32,
                            -1.0 / math.sqrt(a3), 1.0 / math.sqrt(a3))
    x3 = jax.random.normal(jax.random.PRNGKey(4), (4, 5, a3), jnp.float32)
    out3 = jax.block_until_ready(action_embedder_forward(x3, w3, b3))
    ref3 = x3 @ w3.T + b3
    assert out3.shape == (4, 5, h3)
    assert jnp.allclose(out3, ref3, atol=1e-4, rtol=1e-5)

    print("KERNEL_OK")
</pallas_src>

<mosaic_0001>
module attributes {stable_mosaic.version = 11 : i64} {
  func.func @_linear_kernel(%arg0: i32, %arg1: memref<8x32xf32, #tpu.memory_space<vmem>>, %arg2: memref<32x128xf32, #tpu.memory_space<vmem>>, %arg3: memref<1x128xf32, #tpu.memory_space<vmem>>, %arg4: memref<8x128xf32, #tpu.memory_space<vmem>>) attributes {dimension_semantics = [#tpu.dimension_semantics<parallel>], iteration_bounds = array<i64: 2>, scalar_prefetch = 0 : i64, scratch_operands = 0 : i64, tpu.core_type = #tpu.core_type<tc>, window_params = [{transform_indices = @transform_0, window_bounds = array<i64: 8, 32>}, {pipeline_mode = #tpu.pipeline_mode<synchronous>, transform_indices = @transform_1, window_bounds = array<i64: 32, 128>}, {pipeline_mode = #tpu.pipeline_mode<synchronous>, transform_indices = @transform_2, window_bounds = array<i64: 1, 128>}, {transform_indices = @transform_3, window_bounds = array<i64: 8, 128>}]} {
    %c0 = arith.constant 0 : index
    %c0_0 = arith.constant 0 : index
    %0 = vector.load %arg1[%c0, %c0_0] : memref<8x32xf32, #tpu.memory_space<vmem>>, vector<8x32xf32>
    %c0_1 = arith.constant 0 : index
    %c0_2 = arith.constant 0 : index
    %1 = vector.load %arg2[%c0_1, %c0_2] : memref<32x128xf32, #tpu.memory_space<vmem>>, vector<32x128xf32>
    %cst = arith.constant dense<0.000000e+00> : vector<8x128xf32>
    %2 = tpu.matmul %0, %1, %cst {dimension_numbers = #tpu.dot_dimension_numbers<[1], [0], [0], [1], [0, 0, 1, 1], [], []>} : vector<8x32xf32>, vector<32x128xf32>, vector<8x128xf32> -> vector<8x128xf32>
    %c0_3 = arith.constant 0 : index
    %c0_4 = arith.constant 0 : index
    %3 = vector.load %arg3[%c0_3, %c0_4] : memref<1x128xf32, #tpu.memory_space<vmem>>, vector<1x128xf32>
    %4 = vector.broadcast %3 : vector<1x128xf32> to vector<8x128xf32>
    %5 = arith.addf %2, %4 : vector<8x128xf32>
    %c0_5 = arith.constant 0 : index
    %c0_6 = arith.constant 0 : index
    %6 = vector.load %arg4[%c0_5, %c0_6] : memref<8x128xf32, #tpu.memory_space<vmem>>, vector<8x128xf32>
    tpu.vector_store %arg4[%c0_5, %c0_6], %5 {strides = array<i32>} : memref<8x128xf32, #tpu.memory_space<vmem>>, vector<8x128xf32>,
    return
  }
  func.func @transform_0(%arg0: i32) -> (i32, i32) {
    %c0_i32 = arith.constant 0 : i32
    %c0_i32_0 = arith.constant 0 : i32
    return %arg0, %c0_i32 : i32, i32
  }
  func.func @transform_1(%arg0: i32) -> (i32, i32) {
    %c0_i32 = arith.constant 0 : i32
    %c0_i32_0 = arith.constant 0 : i32
    %c0_i32_1 = arith.constant 0 : i32
    return %c0_i32, %c0_i32_0 : i32, i32
  }
  func.func @transform_2(%arg0: i32) -> (i32, i32) {
    %c0_i32 = arith.constant 0 : i32
    %c0_i32_0 = arith.constant 0 : i32
    %c0_i32_1 = arith.constant 0 : i32
    return %c0_i32, %c0_i32_0 : i32, i32
  }
  func.func @transform_3(%arg0: i32) -> (i32, i32) {
    %c0_i32 = arith.constant 0 : i32
    %c0_i32_0 = arith.constant 0 : i32
    return %arg0, %c0_i32 : i32, i32
  }
}

</mosaic_0001>

<bundles_post_ra>
// kernel: tpu_custom_call.1
= control target key start
LH: loop header
LB: loop body
LE: loop exit
PB: predicated region body
PF: predicated region fallthrough
CT: control target
= control target key end

     0   :  { %8 = vsyncpa [#allocation3], 0  ;;  %s704_s0 = inlined_call_operand.hbm [shape: f32[16,32], index: 0, kind: input, shape index: {}]   ;;  %s705_s1 = inlined_call_operand.hbm [shape: f32[32,128], index: 1, kind: input, shape index: {}]   ;;  %s706_s2 = inlined_call_operand.vmem [shape: f32[1,128], index: 2, kind: input, shape index: {}]   ;;  %s707_s3 = inlined_call_operand.hbm [shape: f32[16,128], index: 3, kind: output, shape index: {}]  }
   0x1   :  { %10 = vsyncpa [#allocation3 + $0x1], 0 }
   0x2   :  { %11 = vsyncpa [#allocation6], 0 }
   0x3   :  { %12 = vsyncpa [#allocation4], 0 }
   0x4   :  { %14 = vsyncpa [#allocation4 + $0x1], 0  ;;  %s565_s12 = smov 0   ;;  %s567_s13 = smov 0  }
   0x5   :  { %s569_s14 = smov 0   ;;  %s571_s15 = smov 0  }
   0x6 LB: > { %s130_s18 = sshll.u32 %s705_s1, 4  ;;  %s589_s19 = sadd.s32 4294967295, %s540_s15   ;;  %s540_s15 = sphi %s571_s15, %s717_s15   ;;  %s536_s14 = sphi %s569_s14, %s716_s14   ;;  %s532_s13 = sphi %s567_s13, %s715_s13   ;;  %s528_s12 = sphi %s565_s12, %s714_s12   ;;  %s131_s18 = int_to_ptr.hbm [resolvable:$true] %s130_s18 }
   0x7   : > { %p336_p0 = scmp.ge.s32.totalorder %s540_s15, 1  ;;  %p41_p1 = scmp.eq.s32.totalorder %s589_s19, 0 }
   0x8   : > { %p119_p2 = scmp.lt.s32.totalorder %s540_s15, 3  ;;  %s542_s21 = smov [#allocation5]  }
   0x9   : > { %s132_s22 = sshll.u32 %s542_s21, 4  ;;  %s543_s23 = smov 128   ;;  %s133_s22 = int_to_ptr.vmem [resolvable:$true] %s132_s22 }
   0xa   : > { %p594_p3 = pnand %p336_p0, %p119_p2  ;;  %s544_s24 = smov 8  }
   0xb   : > { %s335_s25 = sadd.s32 4294967294, %s540_s15   ;;  %s605_s26 = sadd.s32 1, %s540_s15  }
   0xc   : > { %p358_p4 = pneg %p594_p3  ;;  %s27_s27 = sadd.s32 1, %s536_s14 }
   0xd   : > { %s24_s28 = ssub.s32 %s540_s15, %s605_s26  ;;  %p34_p7 = scmp.ne.s32.totalorder %s536_s14, %s532_s13 }
   0xe   : > { %p359_p6 = pnand %p358_p4, %p41_p1  ;;  %p25_p8 = scmp.eq.s32.totalorder %s24_s28, 0 }
   0xf   : > { %p35_p9 = scmp.eq.s32.totalorder %s540_s15, 0  ;;  %p40_p10 = scmp.ne.s32.totalorder %s532_s13, %s528_s12 }
  0x10   : > { %361 = dma.hbm_to_vmem [thread:$0]  (!%p359_p6), %s131_s18, 512, %s133_s22, [#allocation6], %s543_s23, %s543_s23, %s544_s24  }
  0x11   : > { %p106_p11 = scmp.eq.s32.totalorder %s589_s19, 1  ;;  %p621_p12 = por %p41_p1, %p40_p10 }
  0x12   : > { %s617_s29 = scalar_select %p25_p8, %s536_s14, %s27_s27  }
  0x13   : > { %p625_p13 = por %p106_p11, %p34_p7  ;;  %p112_p0 = scmp.eq.s32.totalorder %s335_s25, 1 }
  0x14   : > { %p36_p2 = por %p35_p9, %p34_p7  ;;  %s149_s5 = sand.u32 1, %s536_s14  }
  0x15   : > { %p630_p4 = por %p112_p0, %p40_p10  ;;  %p371_p6 = scmp.lt.s32.totalorder %s540_s15, 2 }
  0x16   : > { %s339_s7 = sshll.u32 %s149_s5, 3  ;;  %s340_s8 = sshll.u32 %s540_s15, 3 }
  0x17   : > { %s157_s11 = scalar_lea.hbm %s704_s0, %s340_s8  ;;  %s153_s17 = scalar_lea.vmem [#allocation2], %s339_s7 }
  0x18   : > { %s159_s16 = sshll.u32 %s157_s11, 4  ;;  %s161_s18 = sshll.u32 %s153_s17, 4  ;;  %s160_s16 = int_to_ptr.hbm [resolvable:$true] %s159_s16  ;;  %s162_s18 = int_to_ptr.vmem [resolvable:$true] %s161_s18 }
  0x19   : > { %p639_p8 = pnand %p371_p6, %p36_p2  ;;  %s150_s22 = scalar_lea.sflag [#allocation3], %s149_s5 }
  0x1a   : > { %s440_s23 = sshra.s32 %s160_s16, 4  ;;  %s447_s28 = scalar_lea.hbm %s704_s0, 16  ;;  %s441_s23 = int_to_ptr.hbm [resolvable:$true] %s440_s23 }
  0x1b   : > { %s442_s24 = scalar_lea.hbm %s441_s23, 8  ;;  %p444_p9 = pneg %p639_p8 }
  0x1c   : > { %p443_p7 = scmp.ne.s32.totalorder %s441_s23, %s442_s24  ;;  %p448_p0 = scmp.lt.s32.totalorder %s441_s23, %s704_s0 }
  0x1d   : > { %p449_p2 = scmp.lt.s32.totalorder %s447_s28, %s442_s24 }
  0x1e   : > { %p445_p10 = pnand %p444_p9, %p443_p7 }
  0x1f   : > { %p450_p6 = por %p449_p2, %p448_p0 }
  0x20   : > { %p446_p11 = pneg %p445_p10 }
  0x22   : > { %p451_p5 = pnand %p450_p6, %p446_p11 }
  0x24   : > { %454 = shalt.err (!%p451_p5)
}
  0x25   : > { %365 = dma.hbm_to_vmem [thread:$0]  (!%p639_p8), %s160_s16, 128, %s162_s18, %s150_s22  }
  0x26   : > { %170 = sbr.rel (%p594_p3) target bundleno = 185 (0xb9), region = 32  ;;  %s656_s5 = sand.u32 (!%p594_p3), 1, %s532_s13  }
  0x27   : > { %s342_s9 = sshll.u32 (!%p594_p3), %s656_s5, 3  ;;  %s173_s10 = scalar_lea.sflag (!%p594_p3), [#allocation3], %s656_s5 }
  0x28   : > { %s176_s11 = scalar_lea.vmem (!%p594_p3), [#allocation2], %s342_s9 }
  0x2b   : > { %515 = dma.done.wait (%p621_p12), %s173_s10, 128  }
  0x2c   : > { %517 = vsyncadd (%p621_p12), %s173_s10, 4294967168 }
  0x2d   : > { %519 = dma.done.wait (%p41_p1), [#allocation6], 512  }
  0x2e   : > { %521 = vsyncadd (%p41_p1), [#allocation6], 4294966784  ;;  %v209_v0 = vld [vmem:[#allocation5 + $0x18] sm:$0xff]  ;;  %v208_v1 = vld [vmem:[#allocation5 + $0x10] sm:$0xff]  ;;  %vm214_vm0 = vcmask 261120   ;;  %s347_s20 = sshll.u32 %s589_s19, 3 }
  0x2f   : > { %230 = vmatpush.msra.mxu0 %v209_v0  ;;  %v207_v2 = vld [vmem:[#allocation5 + $0x8] sm:$0xff]  ;;  %v206_v3 = vld [vmem:[#allocation5] sm:$0xff]  ;;  %v205_v4 = vld [vmem:[%s176_s11] sm:$0xff]  ;;  %s250_s17 = scalar_lea.hbm %s707_s3, %s347_s20  ;;  %s204_s22 = scalar_lea.vmem [#allocation7], %s342_s9 }
  0x30   : > { %v409_v5 = vld [vmem:[%s706_s2] ss:$0 sm:$0xff]  ;;  %s252_s23 = sshll.u32 %s204_s22, 4  ;;  %s254_s24 = sshll.u32 %s250_s17, 4  ;;  %s253_s23 = int_to_ptr.vmem [resolvable:$true] %s252_s23  ;;  %s255_s24 = int_to_ptr.hbm [resolvable:$true] %s254_s24 }
  0x31   : > { %231 = vmatpush.msra.mxu0 %v208_v1  ;;  %s240_s25 = scalar_lea.sflag [#allocation4], %s656_s5  ;;  %s484_s27 = sshra.s32 %s255_s24, 4  ;;  %s485_s27 = int_to_ptr.hbm [resolvable:$true] %s484_s27 }
  0x32   : > { %s486_s19 = scalar_lea.hbm %s485_s27, 8  ;;  %s490_s8 = scalar_lea.hbm %s707_s3, 16 }
  0x33   : > { %232 = vmatpush.msra.mxu0 %v207_v2  ;;  %p487_p1 = scmp.ne.s32.totalorder %s485_s27, %s486_s19  ;;  %p491_p12 = scmp.lt.s32.totalorder %s485_s27, %s707_s3 }
  0x34   : > { %p492_p8 = scmp.lt.s32.totalorder %s490_s8, %s486_s19 }
  0x35   : > { %233 = vmatpush.msra.mxu0 %v206_v3  ;;  %p488_p3 = pnand %p487_p1, %p625_p13 }
  0x36   : > { %345 = vmatmul.msk.f32.vlgmr.msra.gmra.mxu0 %vm214_vm0, %v205_v4  ;;  %p493_p7 = por %p492_p8, %p491_p12 }
  0x37   : > { %p489_p5 = pneg %p488_p3 }
  0x39   : > { %p494_p9 = pnand %p493_p7, %p489_p5 }
  0xb3   : > { %v235_v6 = vpop.f32.mrf.mxu0 }
  0xb4   : > { %v236_v7 = vadd.f32 %v409_v5, %v235_v6 }
  0xb6   : > { %238 = vst [vmem:[%s204_s22] sm:$0xff] %v236_v7 }
  0xb7   : > { %497 = shalt.err (!%p494_p9)
}
  0xb8   : > { %356 = dma.vmem_to_hbm [thread:$0]  (%p625_p13), %s253_s23, 128, %s255_s24, %s240_s25  }
  0xb9 PF: > { %s266_s5 = sand.u32 1, %s528_s12   ;;  %p713_p10 = scmp.ge.s32.totalorder %s540_s15, 2 }
  0xba   : > { %s267_s11 = scalar_lea.sflag [#allocation4], %s266_s5 }
  0xbb   : > { %p367_p11 = pnand %p713_p10, %p630_p4 }
  0xbd   : > { %p368_p0 = pneg %p367_p11 }
  0xbf   : > { %523 = dma.done.wait (%p368_p0), %s267_s11, 128  }
  0xc0   : > { %525 = vsyncadd (%p368_p0), %s267_s11, 4294967168  ;;  %p17_p2 = scmp.ge.s32.totalorder %s605_s26, 4   ;;  %s714_s12 = smov %s532_s13 }
  0xc1   : > { %s715_s13 = smov %s536_s14  ;;  %s716_s14 = smov %s617_s29 }
  0xc2   : > { %s717_s15 = smov %s605_s26  ;;  %19 = sbr.rel (!%p17_p2) target bundleno = 6 (0x6), region = 81 }
  0xc7   :  { %273 = vsyncpa [#allocation3], 1 }
  0xc8   :  { %275 = vsyncpa [#allocation3 + $0x1], 1 }
  0xc9   :  { %276 = vsyncpa [#allocation6], 1 }
  0xca   :  { %277 = vsyncpa [#allocation4], 1 }
  0xcb   :  { %279 = vsyncpa [#allocation4 + $0x1], 1 }

</bundles_post_ra>
